<compile_context>
chip_gen: v5e
topology: v5e:2x2
jax: 0.10.0
libtpu: 0.0.40
codegen_flags: <defaults>
</compile_context>

<pallas_src>
import jax
import jax.numpy as jnp
from jax.experimental import pallas as pl
from jax.experimental.pallas import tpu as pltpu


def _round_up(x, m):
    return ((x + m - 1) // m) * m


def _cdiv(a, b):
    return (a + b - 1) // b


def _hardswish(x):
    # PyTorch nn.Hardswish: x * relu6(x + 3) / 6
    return x * jnp.clip(x + 3.0, 0.0, 6.0) * (1.0 / 6.0)


def _mlp_kernel(x_ref, w1_ref, w_ref, b_ref, o_ref):
    # x_ref : [tile, S]   bf16  (narrow, un-padded state block)
    # w1_ref: [S, P]      bf16  (layer-1 weights, grid-invariant)
    # w_ref : [3, P, P]   bf16  (layer-2..4 weights, grid-invariant)
    # b_ref : [8, P]      f32   (rows 0..3 = biases of layers 1..4)
    # o_ref : [tile, P]   bf16  (lane-dense logits block)

    # Layer 1: Linear + ReLU (bf16 MXU inputs, f32 accumulate + f32 epilogue)
    h = jnp.dot(x_ref[...], w1_ref[...],
                preferred_element_type=jnp.float32) + b_ref[0:1, :]
    h = jnp.maximum(h, 0.0)

    # Layer 2: Linear + ReLU
    h = jnp.dot(h.astype(jnp.bfloat16), w_ref[0],
                preferred_element_type=jnp.float32) + b_ref[1:2, :]
    h = jnp.maximum(h, 0.0)

    # Layer 3: Linear + Hardswish
    h = jnp.dot(h.astype(jnp.bfloat16), w_ref[1],
                preferred_element_type=jnp.float32) + b_ref[2:3, :]
    h = _hardswish(h)

    # Layer 4: Linear (logits), lane-dense store
    h = jnp.dot(h.astype(jnp.bfloat16), w_ref[2],
                preferred_element_type=jnp.float32) + b_ref[3:4, :]
    o_ref[...] = h.astype(o_ref.dtype)


def pack_params(params, pad_dim):
    """Pack parameters for the kernel.

    Layer-1 weights stay a separate [state_dim, P] operand (so the state does
    not need feature padding in HBM); layer 2-4 weights are zero-padded to
    [P, P] and stacked; all four biases go into one (8, P) f32 tile (rows 0-3).
    Zero padding is exact: padded input lanes hit zero weight rows, padded
    output lanes get zero bias and stay zero through ReLU / Hardswish.
    """
    (w1, b1) = params[0]
    state_dim = w1.shape[0]
    w1_p = jnp.zeros((state_dim, pad_dim), jnp.float32).at[:, :w1.shape[1]].set(w1)
    bias = jnp.zeros((8, pad_dim), jnp.float32)
    bias = bias.at[0, :b1.shape[-1]].set(jnp.reshape(b1, (-1,)))

    ws = []
    for layer, (w, b) in enumerate(params[1:], start=1):
        fi, fo = w.shape
        ws.append(jnp.zeros((pad_dim, pad_dim), jnp.float32).at[:fi, :fo].set(w))
        bias = bias.at[layer, :fo].set(jnp.reshape(b, (-1,)))

    W1 = w1_p.astype(jnp.bfloat16)             # [S, P]
    W = jnp.stack(ws).astype(jnp.bfloat16)     # [3, P, P]
    return W1, W, bias                         # bias: [8, P] f32


def actor_discrete_ppo_forward(state, params, *, batch_tile=1024):
    """Pallas forward. state: [B, state_dim] f32 -> logits [B, action_dim] f32."""
    w1 = params[0][0]
    state_dim, mid_dim = w1.shape
    action_dim = params[3][0].shape[1]

    # Hidden/output feature dims padded to one lane-aligned width P (>=128).
    P = _round_up(max(mid_dim, action_dim), 128)
    W1, W, Bias = pack_params(params, P)

    B = state.shape[0]
    SUB = 16                                    # bf16 sublane packing
    B_req = _round_up(B, SUB)
    n_steps = max(1, _cdiv(B_req, batch_tile))
    if n_steps == 1 and B_req >= 2 * SUB:
        n_steps = 2                             # v7x: give both TensorCores a grid step
    tile = _round_up(_cdiv(B_req, n_steps), SUB)
    B_pad = tile * n_steps

    # bf16 state, NO feature padding (layer 1 rounds to bf16 before the MXU anyway).
    x = state.astype(jnp.bfloat16)
    if B_pad != B:
        x = jnp.zeros((B_pad, state_dim), jnp.bfloat16).at[:B].set(x)

    flops = 2 * B_pad * P * (state_dim + 3 * P)
    bytes_accessed = (x.size * 2 + W1.size * 2 + W.size * 2 + Bias.size * 4
                      + B_pad * P * 2)

    # Only force a VMEM limit when the footprint would brush v5e's 16 MiB
    # scoped default (big tiles / big mid_dim); otherwise keep the default.
    vmem_need = (2 * tile * state_dim * 2       # double-buffered bf16 input
                 + 2 * tile * P * 2             # double-buffered bf16 output
                 + W1.size * 2 + W.size * 2 + Bias.size * 4)
    vmem_limit = (int(min(2 * vmem_need, 96 * 1024 * 1024))
                  if vmem_need > 12 * 1024 * 1024 else None)

    def run(resident_mode):
        extra = {} if resident_mode is None else {"pipeline_mode": resident_mode}
        return pl.pallas_call(
            _mlp_kernel,
            out_shape=jax.ShapeDtypeStruct((B_pad, P), jnp.bfloat16),
            grid=(n_steps,),
            in_specs=[
                pl.BlockSpec((tile, state_dim), lambda i: (i, 0)),    # batch-tiled state
                pl.BlockSpec(W1.shape, lambda i: (0, 0), **extra),    # resident W1
                pl.BlockSpec(W.shape, lambda i: (0, 0, 0), **extra),  # resident W2-4
                pl.BlockSpec(Bias.shape, lambda i: (0, 0), **extra),  # resident biases
            ],
            out_specs=pl.BlockSpec((tile, P), lambda i: (i, 0)),      # lane-dense logits
            compiler_params=pltpu.CompilerParams(
                dimension_semantics=("parallel",),
                vmem_limit_bytes=vmem_limit),
            cost_estimate=pl.CostEstimate(
                flops=flops, transcendentals=0, bytes_accessed=bytes_accessed),
        )(x, W1, W, Bias)

    try:
        # Grid-invariant operands don't need double-buffering.
        out = run(pl.Buffered(1))
    except Exception:
        # pipeline_mode=pl.Buffered(1) is a newer Pallas feature; fall back to
        # default double-buffering (costs only ~100 KiB extra VMEM at P=128).
        out = run(None)

    # Slice back to the logical logits shape, upcast to f32 for downstream use.
    return out[:B, :action_dim].astype(jnp.float32)


def init_params(key, state_dim, mid_dim, action_dim):
    """Deterministic init mimicking torch.nn.Linear default U(-1/sqrt(in), 1/sqrt(in)).
    Weights are stored transposed: [in_features, out_features]."""
    dims = [(state_dim, mid_dim), (mid_dim, mid_dim),
            (mid_dim, mid_dim), (mid_dim, action_dim)]
    params = []
    for (fan_in, fan_out) in dims:
        key, kw, kb = jax.random.split(key, 3)
        bound = 1.0 / jnp.sqrt(float(fan_in))
        w = jax.random.uniform(kw, (fan_in, fan_out), jnp.float32, -bound, bound)
        b = jax.random.uniform(kb, (1, fan_out), jnp.float32, -bound, bound)
        params.append((w, b))
    return params


def _reference_forward(state, params):
    """JAX reference with the same numerics as the kernel (bf16 MXU inputs,
    f32 accumulation, f32 epilogue, bf16 logit store)."""
    h = state
    for idx, (w, b) in enumerate(params):
        acc = jnp.dot(h.astype(jnp.bfloat16), w.astype(jnp.bfloat16),
                      preferred_element_type=jnp.float32) + b
        if idx < 2:
            h = jnp.maximum(acc, 0.0)
        elif idx == 2:
            h = _hardswish(acc)
        else:
            h = acc
    # Kernel stores logits as bf16; wrapper upcasts to f32.
    return h.astype(jnp.bfloat16).astype(jnp.float32)


if __name__ == "__main__":
    key = jax.random.PRNGKey(0)
    batch, state_dim, mid_dim, action_dim = 8, 16, 32, 4

    k_state, k_params = jax.random.split(key)
    state = jax.random.normal(k_state, (batch, state_dim), jnp.float32)
    params = init_params(k_params, state_dim, mid_dim, action_dim)

    logits = actor_discrete_ppo_forward(state, params)
    logits = jax.block_until_ready(logits)

    ref = _reference_forward(state, params)
    assert logits.shape == (batch, action_dim)
    assert jnp.allclose(logits, ref, atol=1e-2, rtol=1e-2), "mismatch vs JAX reference"

    print("KERNEL_OK")
</pallas_src>

<mosaic_0001>
module attributes {stable_mosaic.version = 11 : i64} {
  func.func @_mlp_kernel(%arg0: i32, %arg1: memref<16x16xbf16, #tpu.memory_space<vmem>>, %arg2: memref<16x128xbf16, #tpu.memory_space<vmem>>, %arg3: memref<3x128x128xbf16, #tpu.memory_space<vmem>>, %arg4: memref<8x128xf32, #tpu.memory_space<vmem>>, %arg5: memref<16x128xbf16, #tpu.memory_space<vmem>>) attributes {dimension_semantics = [#tpu.dimension_semantics<parallel>], iteration_bounds = array<i64: 1>, scalar_prefetch = 0 : i64, scratch_operands = 0 : i64, tpu.core_type = #tpu.core_type<tc>, window_params = [{transform_indices = @transform_0, window_bounds = array<i64: 16, 16>}, {pipeline_mode = #tpu.pipeline_mode<synchronous>, transform_indices = @transform_1, window_bounds = array<i64: 16, 128>}, {pipeline_mode = #tpu.pipeline_mode<synchronous>, transform_indices = @transform_2, window_bounds = array<i64: 3, 128, 128>}, {pipeline_mode = #tpu.pipeline_mode<synchronous>, transform_indices = @transform_3, window_bounds = array<i64: 8, 128>}, {transform_indices = @transform_4, window_bounds = array<i64: 16, 128>}]} {
    %c0 = arith.constant 0 : index
    %c0_0 = arith.constant 0 : index
    %0 = vector.load %arg1[%c0, %c0_0] : memref<16x16xbf16, #tpu.memory_space<vmem>>, vector<16x16xbf16>
    %c0_1 = arith.constant 0 : index
    %c0_2 = arith.constant 0 : index
    %1 = vector.load %arg2[%c0_1, %c0_2] : memref<16x128xbf16, #tpu.memory_space<vmem>>, vector<16x128xbf16>
    %cst = arith.constant dense<0.000000e+00> : vector<16x128xf32>
    %2 = tpu.matmul %0, %1, %cst {dimension_numbers = #tpu.dot_dimension_numbers<[1], [0], [0], [1], [0, 0, 1, 1], [], []>} : vector<16x16xbf16>, vector<16x128xbf16>, vector<16x128xf32> -> vector<16x128xf32>
    %c0_3 = arith.constant 0 : index
    %c0_4 = arith.constant 0 : index
    %3 = vector.load %arg4[%c0_3, %c0_4] : memref<8x128xf32, #tpu.memory_space<vmem>>, vector<1x128xf32>
    %4 = vector.broadcast %3 : vector<1x128xf32> to vector<16x128xf32>
    %5 = arith.addf %2, %4 : vector<16x128xf32>
    %cst_5 = arith.constant 0.000000e+00 : f32
    %6 = vector.broadcast %cst_5 : f32 to vector<16x128xf32>
    %7 = arith.maximumf %5, %6 : vector<16x128xf32>
    %8 = arith.truncf %7 : vector<16x128xf32> to vector<16x128xbf16>
    %c0_6 = arith.constant 0 : index
    %c0_7 = arith.constant 0 : index
    %c0_8 = arith.constant 0 : index
    %9 = vector.load %arg3[%c0_6, %c0_7, %c0_8] : memref<3x128x128xbf16, #tpu.memory_space<vmem>>, vector<1x128x128xbf16>
    %10 = vector.shape_cast %9 : vector<1x128x128xbf16> to vector<128x128xbf16>
    %cst_9 = arith.constant dense<0.000000e+00> : vector<16x128xf32>
    %11 = tpu.matmul %8, %10, %cst_9 {dimension_numbers = #tpu.dot_dimension_numbers<[1], [0], [0], [1], [0, 0, 1, 1], [], []>} : vector<16x128xbf16>, vector<128x128xbf16>, vector<16x128xf32> -> vector<16x128xf32>
    %c1 = arith.constant 1 : index
    %c0_10 = arith.constant 0 : index
    %12 = vector.load %arg4[%c1, %c0_10] : memref<8x128xf32, #tpu.memory_space<vmem>>, vector<1x128xf32>
    %13 = vector.broadcast %12 : vector<1x128xf32> to vector<16x128xf32>
    %14 = arith.addf %11, %13 : vector<16x128xf32>
    %cst_11 = arith.constant 0.000000e+00 : f32
    %15 = vector.broadcast %cst_11 : f32 to vector<16x128xf32>
    %16 = arith.maximumf %14, %15 : vector<16x128xf32>
    %17 = arith.truncf %16 : vector<16x128xf32> to vector<16x128xbf16>
    %c1_12 = arith.constant 1 : index
    %c0_13 = arith.constant 0 : index
    %c0_14 = arith.constant 0 : index
    %18 = vector.load %arg3[%c1_12, %c0_13, %c0_14] : memref<3x128x128xbf16, #tpu.memory_space<vmem>>, vector<1x128x128xbf16>
    %19 = vector.shape_cast %18 : vector<1x128x128xbf16> to vector<128x128xbf16>
    %cst_15 = arith.constant dense<0.000000e+00> : vector<16x128xf32>
    %20 = tpu.matmul %17, %19, %cst_15 {dimension_numbers = #tpu.dot_dimension_numbers<[1], [0], [0], [1], [0, 0, 1, 1], [], []>} : vector<16x128xbf16>, vector<128x128xbf16>, vector<16x128xf32> -> vector<16x128xf32>
    %c2 = arith.constant 2 : index
    %c0_16 = arith.constant 0 : index
    %21 = vector.load %arg4[%c2, %c0_16] : memref<8x128xf32, #tpu.memory_space<vmem>>, vector<1x128xf32>
    %22 = vector.broadcast %21 : vector<1x128xf32> to vector<16x128xf32>
    %23 = arith.addf %20, %22 : vector<16x128xf32>
    %cst_17 = arith.constant 3.000000e+00 : f32
    %24 = vector.broadcast %cst_17 : f32 to vector<16x128xf32>
    %25 = arith.addf %23, %24 : vector<16x128xf32>
    %cst_18 = arith.constant 0.000000e+00 : f32
    %cst_19 = arith.constant 6.000000e+00 : f32
    %26 = vector.broadcast %cst_18 : f32 to vector<16x128xf32>
    %27 = arith.maximumf %26, %25 : vector<16x128xf32>
    %28 = vector.broadcast %cst_19 : f32 to vector<16x128xf32>
    %29 = arith.minimumf %28, %27 : vector<16x128xf32>
    %30 = arith.mulf %23, %29 : vector<16x128xf32>
    %cst_20 = arith.constant 0.166666672 : f32
    %31 = vector.broadcast %cst_20 : f32 to vector<16x128xf32>
    %32 = arith.mulf %30, %31 : vector<16x128xf32>
    %33 = arith.truncf %32 : vector<16x128xf32> to vector<16x128xbf16>
    %c2_21 = arith.constant 2 : index
    %c0_22 = arith.constant 0 : index
    %c0_23 = arith.constant 0 : index
    %34 = vector.load %arg3[%c2_21, %c0_22, %c0_23] : memref<3x128x128xbf16, #tpu.memory_space<vmem>>, vector<1x128x128xbf16>
    %35 = vector.shape_cast %34 : vector<1x128x128xbf16> to vector<128x128xbf16>
    %cst_24 = arith.constant dense<0.000000e+00> : vector<16x128xf32>
    %36 = tpu.matmul %33, %35, %cst_24 {dimension_numbers = #tpu.dot_dimension_numbers<[1], [0], [0], [1], [0, 0, 1, 1], [], []>} : vector<16x128xbf16>, vector<128x128xbf16>, vector<16x128xf32> -> vector<16x128xf32>
    %c3 = arith.constant 3 : index
    %c0_25 = arith.constant 0 : index
    %37 = vector.load %arg4[%c3, %c0_25] : memref<8x128xf32, #tpu.memory_space<vmem>>, vector<1x128xf32>
    %38 = vector.broadcast %37 : vector<1x128xf32> to vector<16x128xf32>
    %39 = arith.addf %36, %38 : vector<16x128xf32>
    %40 = arith.truncf %39 : vector<16x128xf32> to vector<16x128xbf16>
    %c0_26 = arith.constant 0 : index
    %c0_27 = arith.constant 0 : index
    %41 = vector.load %arg5[%c0_26, %c0_27] : memref<16x128xbf16, #tpu.memory_space<vmem>>, vector<16x128xbf16>
    tpu.vector_store %arg5[%c0_26, %c0_27], %40 {strides = array<i32>} : memref<16x128xbf16, #tpu.memory_space<vmem>>, vector<16x128xbf16>,
    return
  }
  func.func @transform_0(%arg0: i32) -> (i32, i32) {
    %c0_i32 = arith.constant 0 : i32
    %c0_i32_0 = arith.constant 0 : i32
    return %arg0, %c0_i32 : i32, i32
  }
  func.func @transform_1(%arg0: i32) -> (i32, i32) {
    %c0_i32 = arith.constant 0 : i32
    %c0_i32_0 = arith.constant 0 : i32
    %c0_i32_1 = arith.constant 0 : i32
    return %c0_i32, %c0_i32_0 : i32, i32
  }
  func.func @transform_2(%arg0: i32) -> (i32, i32, i32) {
    %c0_i32 = arith.constant 0 : i32
    %c0_i32_0 = arith.constant 0 : i32
    %c0_i32_1 = arith.constant 0 : i32
    %c0_i32_2 = arith.constant 0 : i32
    return %c0_i32, %c0_i32_0, %c0_i32_1 : i32, i32, i32
  }
  func.func @transform_3(%arg0: i32) -> (i32, i32) {
    %c0_i32 = arith.constant 0 : i32
    %c0_i32_0 = arith.constant 0 : i32
    %c0_i32_1 = arith.constant 0 : i32
    return %c0_i32, %c0_i32_0 : i32, i32
  }
  func.func @transform_4(%arg0: i32) -> (i32, i32) {
    %c0_i32 = arith.constant 0 : i32
    %c0_i32_0 = arith.constant 0 : i32
    return %arg0, %c0_i32 : i32, i32
  }
}

module attributes {stable_mosaic.version = 11 : i64} {
  func.func @_mlp_kernel(%arg0: i32, %arg1: memref<16x16xbf16, #tpu.memory_space<vmem>>, %arg2: memref<16x128xbf16, #tpu.memory_space<vmem>>, %arg3: memref<3x128x128xbf16, #tpu.memory_space<vmem>>, %arg4: memref<8x128xf32, #tpu.memory_space<vmem>>, %arg5: memref<16x128xbf16, #tpu.memory_space<vmem>>) attributes {dimension_semantics = [#tpu.dimension_semantics<parallel>], iteration_bounds = array<i64: 1>, scalar_prefetch = 0 : i64, scratch_operands = 0 : i64, tpu.core_type = #tpu.core_type<tc>, window_params = [{transform_indices = @transform_0, window_bounds = array<i64: 16, 16>}, {pipeline_mode = #tpu.pipeline_mode<synchronous>, transform_indices = @transform_1, window_bounds = array<i64: 16, 128>}, {pipeline_mode = #tpu.pipeline_mode<synchronous>, transform_indices = @transform_2, window_bounds = array<i64: 3, 128, 128>}, {pipeline_mode = #tpu.pipeline_mode<synchronous>, transform_indices = @transform_3, window_bounds = array<i64: 8, 128>}, {transform_indices = @transform_4, window_bounds = array<i64: 16, 128>}]} {
    %c0 = arith.constant 0 : index
    %c0_0 = arith.constant 0 : index
    %0 = vector.load %arg1[%c0, %c0_0] : memref<16x16xbf16, #tpu.memory_space<vmem>>, vector<16x16xbf16>
    %c0_1 = arith.constant 0 : index
    %c0_2 = arith.constant 0 : index
    %1 = vector.load %arg2[%c0_1, %c0_2] : memref<16x128xbf16, #tpu.memory_space<vmem>>, vector<16x128xbf16>
    %cst = arith.constant dense<0.000000e+00> : vector<16x128xf32>
    %2 = tpu.matmul %0, %1, %cst {dimension_numbers = #tpu.dot_dimension_numbers<[1], [0], [0], [1], [0, 0, 1, 1], [], []>} : vector<16x16xbf16>, vector<16x128xbf16>, vector<16x128xf32> -> vector<16x128xf32>
    %c0_3 = arith.constant 0 : index
    %c0_4 = arith.constant 0 : index
    %3 = vector.load %arg4[%c0_3, %c0_4] : memref<8x128xf32, #tpu.memory_space<vmem>>, vector<1x128xf32>
    %4 = vector.broadcast %3 : vector<1x128xf32> to vector<16x128xf32>
    %5 = arith.addf %2, %4 : vector<16x128xf32>
    %cst_5 = arith.constant 0.000000e+00 : f32
    %6 = vector.broadcast %cst_5 : f32 to vector<16x128xf32>
    %7 = arith.maximumf %5, %6 : vector<16x128xf32>
    %8 = arith.truncf %7 : vector<16x128xf32> to vector<16x128xbf16>
    %c0_6 = arith.constant 0 : index
    %c0_7 = arith.constant 0 : index
    %c0_8 = arith.constant 0 : index
    %9 = vector.load %arg3[%c0_6, %c0_7, %c0_8] : memref<3x128x128xbf16, #tpu.memory_space<vmem>>, vector<1x128x128xbf16>
    %10 = vector.shape_cast %9 : vector<1x128x128xbf16> to vector<128x128xbf16>
    %cst_9 = arith.constant dense<0.000000e+00> : vector<16x128xf32>
    %11 = tpu.matmul %8, %10, %cst_9 {dimension_numbers = #tpu.dot_dimension_numbers<[1], [0], [0], [1], [0, 0, 1, 1], [], []>} : vector<16x128xbf16>, vector<128x128xbf16>, vector<16x128xf32> -> vector<16x128xf32>
    %c1 = arith.constant 1 : index
    %c0_10 = arith.constant 0 : index
    %12 = vector.load %arg4[%c1, %c0_10] : memref<8x128xf32, #tpu.memory_space<vmem>>, vector<1x128xf32>
    %13 = vector.broadcast %12 : vector<1x128xf32> to vector<16x128xf32>
    %14 = arith.addf %11, %13 : vector<16x128xf32>
    %cst_11 = arith.constant 0.000000e+00 : f32
    %15 = vector.broadcast %cst_11 : f32 to vector<16x128xf32>
    %16 = arith.maximumf %14, %15 : vector<16x128xf32>
    %17 = arith.truncf %16 : vector<16x128xf32> to vector<16x128xbf16>
    %c1_12 = arith.constant 1 : index
    %c0_13 = arith.constant 0 : index
    %c0_14 = arith.constant 0 : index
    %18 = vector.load %arg3[%c1_12, %c0_13, %c0_14] : memref<3x128x128xbf16, #tpu.memory_space<vmem>>, vector<1x128x128xbf16>
    %19 = vector.shape_cast %18 : vector<1x128x128xbf16> to vector<128x128xbf16>
    %cst_15 = arith.constant dense<0.000000e+00> : vector<16x128xf32>
    %20 = tpu.matmul %17, %19, %cst_15 {dimension_numbers = #tpu.dot_dimension_numbers<[1], [0], [0], [1], [0, 0, 1, 1], [], []>} : vector<16x128xbf16>, vector<128x128xbf16>, vector<16x128xf32> -> vector<16x128xf32>
    %c2 = arith.constant 2 : index
    %c0_16 = arith.constant 0 : index
    %21 = vector.load %arg4[%c2, %c0_16] : memref<8x128xf32, #tpu.memory_space<vmem>>, vector<1x128xf32>
    %22 = vector.broadcast %21 : vector<1x128xf32> to vector<16x128xf32>
    %23 = arith.addf %20, %22 : vector<16x128xf32>
    %cst_17 = arith.constant 3.000000e+00 : f32
    %24 = vector.broadcast %cst_17 : f32 to vector<16x128xf32>
    %25 = arith.addf %23, %24 : vector<16x128xf32>
    %cst_18 = arith.constant 0.000000e+00 : f32
    %cst_19 = arith.constant 6.000000e+00 : f32
    %26 = vector.broadcast %cst_18 : f32 to vector<16x128xf32>
    %27 = arith.maximumf %26, %25 : vector<16x128xf32>
    %28 = vector.broadcast %cst_19 : f32 to vector<16x128xf32>
    %29 = arith.minimumf %28, %27 : vector<16x128xf32>
    %30 = arith.mulf %23, %29 : vector<16x128xf32>
    %cst_20 = arith.constant 0.166666672 : f32
    %31 = vector.broadcast %cst_20 : f32 to vector<16x128xf32>
    %32 = arith.mulf %30, %31 : vector<16x128xf32>
    %33 = arith.truncf %32 : vector<16x128xf32> to vector<16x128xbf16>
    %c2_21 = arith.constant 2 : index
    %c0_22 = arith.constant 0 : index
    %c0_23 = arith.constant 0 : index
    %34 = vector.load %arg3[%c2_21, %c0_22, %c0_23] : memref<3x128x128xbf16, #tpu.memory_space<vmem>>, vector<1x128x128xbf16>
    %35 = vector.shape_cast %34 : vector<1x128x128xbf16> to vector<128x128xbf16>
    %cst_24 = arith.constant dense<0.000000e+00> : vector<16x128xf32>
    %36 = tpu.matmul %33, %35, %cst_24 {dimension_numbers = #tpu.dot_dimension_numbers<[1], [0], [0], [1], [0, 0, 1, 1], [], []>} : vector<16x128xbf16>, vector<128x128xbf16>, vector<16x128xf32> -> vector<16x128xf32>
    %c3 = arith.constant 3 : index
    %c0_25 = arith.constant 0 : index
    %37 = vector.load %arg4[%c3, %c0_25] : memref<8x128xf32, #tpu.memory_space<vmem>>, vector<1x128xf32>
    %38 = vector.broadcast %37 : vector<1x128xf32> to vector<16x128xf32>
    %39 = arith.addf %36, %38 : vector<16x128xf32>
    %40 = arith.truncf %39 : vector<16x128xf32> to vector<16x128xbf16>
    %c0_26 = arith.constant 0 : index
    %c0_27 = arith.constant 0 : index
    %41 = vector.load %arg5[%c0_26, %c0_27] : memref<16x128xbf16, #tpu.memory_space<vmem>>, vector<16x128xbf16>
    tpu.vector_store %arg5[%c0_26, %c0_27], %40 {strides = array<i32>} : memref<16x128xbf16, #tpu.memory_space<vmem>>, vector<16x128xbf16>,
    return
  }
  func.func @transform_0(%arg0: i32) -> (i32, i32) {
    %c0_i32 = arith.constant 0 : i32
    %c0_i32_0 = arith.constant 0 : i32
    return %arg0, %c0_i32 : i32, i32
  }
  func.func @transform_1(%arg0: i32) -> (i32, i32) {
    %c0_i32 = arith.constant 0 : i32
    %c0_i32_0 = arith.constant 0 : i32
    %c0_i32_1 = arith.constant 0 : i32
    return %c0_i32, %c0_i32_0 : i32, i32
  }
  func.func @transform_2(%arg0: i32) -> (i32, i32, i32) {
    %c0_i32 = arith.constant 0 : i32
    %c0_i32_0 = arith.constant 0 : i32
    %c0_i32_1 = arith.constant 0 : i32
    %c0_i32_2 = arith.constant 0 : i32
    return %c0_i32, %c0_i32_0, %c0_i32_1 : i32, i32, i32
  }
  func.func @transform_3(%arg0: i32) -> (i32, i32) {
    %c0_i32 = arith.constant 0 : i32
    %c0_i32_0 = arith.constant 0 : i32
    %c0_i32_1 = arith.constant 0 : i32
    return %c0_i32, %c0_i32_0 : i32, i32
  }
  func.func @transform_4(%arg0: i32) -> (i32, i32) {
    %c0_i32 = arith.constant 0 : i32
    %c0_i32_0 = arith.constant 0 : i32
    return %arg0, %c0_i32 : i32, i32
  }
}

</mosaic_0001>

<bundles_post_ra>
// kernel: tpu_custom_call.1
= control target key start
LH: loop header
LB: loop body
LE: loop exit
PB: predicated region body
PF: predicated region fallthrough
CT: control target
= control target key end

     0   :  { %9 = vsyncpa [#allocation3], 0  ;;  %s733_s0 = inlined_call_operand.hbm [shape: bf16[16,16], index: 0, kind: input, shape index: {}]   ;;  %s734_s1 = inlined_call_operand.hbm [shape: bf16[16,128], index: 1, kind: input, shape index: {}]   ;;  %s735_s2 = inlined_call_operand.hbm [shape: bf16[3,128,128], index: 2, kind: input, shape index: {}]   ;;  %s736_s3 = inlined_call_operand.hbm [shape: f32[8,128], index: 3, kind: input, shape index: {}]   ;;  %s737_s4 = inlined_call_operand.hbm [shape: bf16[16,128], index: 4, kind: output, shape index: {}]  }
   0x1   :  { %10 = vsyncpa [#allocation6], 0 }
   0x2   :  { %11 = vsyncpa [#allocation9], 0 }
   0x3   :  { %12 = vsyncpa [#allocation4], 0  ;;  %s30_s17 = sshll.u32 %s734_s1, 4  ;;  %s674_s18 = smov [#allocation5]   ;;  %s31_s17 = int_to_ptr.hbm [resolvable:$true] %s30_s17 }
   0x4   :  { %s32_s19 = sshll.u32 %s674_s18, 4  ;;  %s17_s22 = sshll.u32 %s733_s0, 4  ;;  %s33_s19 = int_to_ptr.vmem [resolvable:$true] %s32_s19  ;;  %s18_s22 = int_to_ptr.hbm [resolvable:$true] %s17_s22 }
   0x5   :  { %s675_s23 = smov 64   ;;  %s676_s24 = smov 4  }
   0x6   :  { %38 = dma.hbm_to_vmem [thread:$0]  %s31_s17, 128, %s33_s19, [#allocation6], %s675_s23, %s675_s23, %s676_s24  }
   0x7   :  { %s677_s25 = smov [#allocation2]   ;;  %s43_s1 = sshll.u32 %s735_s2, 4  ;;  %s44_s1 = int_to_ptr.hbm [resolvable:$true] %s43_s1 }
   0x8   :  { %s19_s26 = sshll.u32 %s677_s25, 4  ;;  %s57_s30 = sshll.u32 %s736_s3, 4  ;;  %s20_s26 = int_to_ptr.vmem [resolvable:$true] %s19_s26  ;;  %s58_s30 = int_to_ptr.hbm [resolvable:$true] %s57_s30 }
   0x9   :  { %25 = dma.hbm_to_vmem [thread:$0]  %s18_s22, 128, %s20_s26, [#allocation3], %s675_s23, %s675_s23, %s676_s24  }
   0xa   :  { %s678_s5 = smov [#allocation7]   ;;  %s679_s7 = smov [#allocation8]  }
   0xb   :  { %s45_s6 = sshll.u32 %s678_s5, 4  ;;  %s59_s2 = sshll.u32 %s679_s7, 4  ;;  %s46_s6 = int_to_ptr.vmem [resolvable:$true] %s45_s6  ;;  %s60_s2 = int_to_ptr.vmem [resolvable:$true] %s59_s2 }
   0xc   :  { %51 = dma.hbm_to_vmem [thread:$0]  %s44_s1, 3072, %s46_s6, [#allocation6], %s675_s23, %s675_s23, %s676_s24  }
   0xd   :  { %62 = dma.hbm_to_vmem [thread:$0]  %s58_s30, 128, %s60_s2, [#allocation9]  }
   0xe   :  { %666 = dma.done.wait [#allocation3], 128  }
   0xf   :  { %667 = vsyncadd [#allocation3], 4294967168 }
  0x10   :  { %668 = dma.done.wait [#allocation6], 3200  }
  0x11   :  { %669 = vsyncadd [#allocation6], 4294964096 }
  0x12   :  { %670 = dma.done.wait [#allocation9], 128  }
  0x13   :  { %671 = vsyncadd [#allocation9], 4294967168  ;;  %v505_v0 = vld [vmem:[#allocation5] sm:$0xff]  ;;  %v504_v2 = vld [vmem:[#allocation2] sm:$0xff]  ;;  %vm97_vm0 = vcmask 130048   ;;  %s680_s3 = smov [#allocation10]  }
  0x14   :  { %v513_v1 = vld [vmem:[#allocation7 + $0x38] sm:$0xff]  ;;  %108 = vmatpush.bf16.msra.mxu0 %v505_v0  ;;  %v512_v3 = vld [vmem:[#allocation7 + $0x30] sm:$0xff]  ;;  %v511_v4 = vld [vmem:[#allocation7 + $0x28] sm:$0xff]  ;;  %s382_s8 = sshll.u32 %s680_s3, 4  ;;  %s384_s11 = sshll.u32 %s737_s4, 4  ;;  %s383_s8 = int_to_ptr.vmem [resolvable:$true] %s382_s8  ;;  %s385_s11 = int_to_ptr.hbm [resolvable:$true] %s384_s11 }
  0x15   :  { %184 = vmatpush.bf16.msra.mxu1 %v513_v1  ;;  %v510_v5 = vld [vmem:[#allocation7 + $0x20] sm:$0xff]  ;;  %v509_v6 = vld [vmem:[#allocation7 + $0x18] sm:$0xff]  ;;  %v508_v7 = vld [vmem:[#allocation7 + $0x10] sm:$0xff] }
  0x16   :  { %v507_v8 = vld [vmem:[#allocation7 + $0x8] sm:$0xff]  ;;  %v506_v9 = vld [vmem:[#allocation7] sm:$0xff]  ;;  %v521_v10 = vld [vmem:[#allocation7 + $0x78] sm:$0xff] }
  0x17   :  { %407 = vmatmul.msk.bf16.vlgmr.msra.gmra.mxu0 %vm97_vm0, %v504_v2  ;;  %268 = vmatpush.bf16.msra.mxu2 %v521_v10  ;;  %v520_v11 = vld [vmem:[#allocation7 + $0x70] sm:$0xff]  ;;  %v519_v12 = vld [vmem:[#allocation7 + $0x68] sm:$0xff]  ;;  %v518_v13 = vld [vmem:[#allocation7 + $0x60] sm:$0xff] }
  0x18   :  { %v542_v15 = vld [vmem:[#allocation8] ss:$0 sm:$0xff]  ;;  %v517_v22 = vld [vmem:[#allocation7 + $0x58] sm:$0xff]  ;;  %v516_v23 = vld [vmem:[#allocation7 + $0x50] sm:$0xff] }
  0x19   :  { %185 = vmatpush.bf16.msra.mxu1 %v512_v3  ;;  %v515_v24 = vld [vmem:[#allocation7 + $0x48] sm:$0xff]  ;;  %v514_v25 = vld [vmem:[#allocation7 + $0x40] sm:$0xff]  ;;  %v529_v26 = vld [vmem:[#allocation7 + $0xb8] sm:$0xff] }
  0x1a   :  { %360 = vmatpush.bf16.msra.mxu3 %v529_v26  ;;  %v528_v27 = vld [vmem:[#allocation7 + $0xb0] sm:$0xff]  ;;  %v543_v29 = vld [vmem:[#allocation8 + $0x1] ss:$0 sm:$0xff]  ;;  %v527_v36 = vld [vmem:[#allocation7 + $0xa8] sm:$0xff] }
  0x1b   :  { %269 = vmatpush.bf16.msra.mxu2 %v520_v11  ;;  %v526_v37 = vld [vmem:[#allocation7 + $0xa0] sm:$0xff]  ;;  %v525_v38 = vld [vmem:[#allocation7 + $0x98] sm:$0xff]  ;;  %v524_v39 = vld [vmem:[#allocation7 + $0x90] sm:$0xff] }
  0x1c   :  { %v523_v40 = vld [vmem:[#allocation7 + $0x88] sm:$0xff]  ;;  %v522_v41 = vld [vmem:[#allocation7 + $0x80] sm:$0xff] }
  0x1d   :  { %186 = vmatpush.bf16.msra.mxu1 %v511_v4  ;;  %v544_v42 = vld [vmem:[#allocation8 + $0x2] ss:$0 sm:$0xff]  ;;  %v545_v59 = vld [vmem:[#allocation8 + $0x3] ss:$0 sm:$0xff] }
  0x1e   :  { %361 = vmatpush.bf16.msra.mxu3 %v528_v27 }
  0x1f   :  { %270 = vmatpush.bf16.msra.mxu2 %v519_v12 }
  0x21   :  { %187 = vmatpush.bf16.msra.mxu1 %v510_v5 }
  0x22   :  { %362 = vmatpush.bf16.msra.mxu3 %v527_v36 }
  0x23   :  { %271 = vmatpush.bf16.msra.mxu2 %v518_v13 }
  0x25   :  { %188 = vmatpush.bf16.msra.mxu1 %v509_v6 }
  0x26   :  { %363 = vmatpush.bf16.msra.mxu3 %v526_v37 }
  0x27   :  { %272 = vmatpush.bf16.msra.mxu2 %v517_v22 }
  0x29   :  { %189 = vmatpush.bf16.msra.mxu1 %v508_v7 }
  0x2a   :  { %364 = vmatpush.bf16.msra.mxu3 %v525_v38 }
  0x2b   :  { %273 = vmatpush.bf16.msra.mxu2 %v516_v23 }
  0x2d   :  { %190 = vmatpush.bf16.msra.mxu1 %v507_v8 }
  0x2e   :  { %365 = vmatpush.bf16.msra.mxu3 %v524_v39 }
  0x2f   :  { %274 = vmatpush.bf16.msra.mxu2 %v515_v24 }
  0x31   :  { %191 = vmatpush.bf16.msra.mxu1 %v506_v9 }
  0x32   :  { %366 = vmatpush.bf16.msra.mxu3 %v523_v40 }
  0x33   :  { %275 = vmatpush.bf16.msra.mxu2 %v514_v25 }
  0x36   :  { %367 = vmatpush.bf16.msra.mxu3 %v522_v41 }
  0x94   :  { %v110_v14 = vpop.f32.mrf.mxu0 }
  0x95   :  { %v111_v16 = vadd.f32 %v542_v15, %v110_v14 }
  0x97   :  { %v115_v19 = vmax.f32 %v111_v16, 0.0 }
  0x9c   :  { %v112_v17 = vpop.f32.mrf.mxu0 }
  0x9d   :  { %v113_v18 = vadd.f32 %v542_v15, %v112_v17 }
  0x9f   :  { %v116_v20 = vmax.f32 %v113_v18, 0.0 }
  0xa1   :  { %v117_v21 = vpack.c.bf16 %v116_v20, %v115_v19 }
  0xa3   :  { %192 = vmatmul.bf16.vlgmr.msra.gmra.mxu1 %v117_v21 }
 0x120   :  { %v193_v28 = vpop.f32.mrf.mxu1 }
 0x121   :  { %v194_v30 = vadd.f32 %v543_v29, %v193_v28 }
 0x123   :  { %v198_v33 = vmax.f32 %v194_v30, 0.0 }
 0x128   :  { %v195_v31 = vpop.f32.mrf.mxu1 }
 0x129   :  { %v196_v32 = vadd.f32 %v543_v29, %v195_v31 }
 0x12b   :  { %v199_v34 = vmax.f32 %v196_v32, 0.0 }
 0x12d   :  { %v200_v35 = vpack.c.bf16 %v199_v34, %v198_v33 }
 0x12f   :  { %276 = vmatmul.bf16.vlgmr.msra.gmra.mxu2 %v200_v35 }
 0x1b2   :  { %v277_v43 = vpop.f32.mrf.mxu2 }
 0x1b3   :  { %v278_v44 = vadd.f32 %v544_v42, %v277_v43 }
 0x1b5   :  { %v282_v45 = vadd.f32 3.0, %v278_v44 }
 0x1b7   :  { %v284_v46 = vmax.f32 %v282_v45, 0.0 }
 0x1b9   :  { %v286_v49 = vmin.f32 %v284_v46, 6.0 }
 0x1ba   :  { %v279_v47 = vpop.f32.mrf.mxu2 }
 0x1bb   :  { %v280_v48 = vadd.f32 %v544_v42, %v279_v47  ;;  %v288_v52 = vmul.f32 %v286_v49, %v278_v44 }
 0x1bd   :  { %v283_v50 = vadd.f32 3.0, %v280_v48  ;;  %v290_v55 = vmul.f32 0.16666667, %v288_v52 }
 0x1bf   :  { %v285_v51 = vmax.f32 %v283_v50, 0.0 }
 0x1c1   :  { %v287_v53 = vmin.f32 %v285_v51, 6.0 }
 0x1c3   :  { %v289_v54 = vmul.f32 %v287_v53, %v280_v48 }
 0x1c5   :  { %v291_v56 = vmul.f32 0.16666667, %v289_v54 }
 0x1c7   :  { %v292_v57 = vpack.c.bf16 %v291_v56, %v290_v55 }
 0x1c9   :  { %368 = vmatmul.bf16.vlgmr.msra.gmra.mxu3 %v292_v57 }
 0x24c   :  { %v369_v58 = vpop.f32.mrf.mxu3 }
 0x24d   :  { %v370_v61 = vadd.f32 %v545_v59, %v369_v58 }
 0x254   :  { %v371_v60 = vpop.f32.mrf.mxu3 }
 0x255   :  { %v372_v62 = vadd.f32 %v545_v59, %v371_v60 }
 0x257   :  { %v533_v63 = vpack.c.bf16 %v372_v62, %v370_v61 }
 0x259   :  { %534 = vst [vmem:[#allocation10] sm:$0xff] %v533_v63  }
 0x25a   :  { %390 = dma.vmem_to_hbm [thread:$0]  %s383_s8, 128, %s385_s11, [#allocation4], %s675_s23, %s675_s23, %s676_s24  }
 0x25b   :  { %672 = dma.done.wait [#allocation4], 128  }
 0x25c   :  { %673 = vsyncadd [#allocation4], 4294967168 }
 0x25d   :  { %395 = vsyncpa [#allocation3], 1 }
 0x25e   :  { %396 = vsyncpa [#allocation6], 1 }
 0x25f   :  { %397 = vsyncpa [#allocation9], 1 }
 0x260   :  { %398 = vsyncpa [#allocation4], 1 }

// kernel: tpu_custom_call.1
= control target key start
LH: loop header
LB: loop body
LE: loop exit
PB: predicated region body
PF: predicated region fallthrough
CT: control target
= control target key end

     0   :  { %9 = vsyncpa [#allocation3], 0  ;;  %s733_s0 = inlined_call_operand.hbm [shape: bf16[16,16], index: 0, kind: input, shape index: {}]   ;;  %s734_s1 = inlined_call_operand.hbm [shape: bf16[16,128], index: 1, kind: input, shape index: {}]   ;;  %s735_s2 = inlined_call_operand.hbm [shape: bf16[3,128,128], index: 2, kind: input, shape index: {}]   ;;  %s736_s3 = inlined_call_operand.hbm [shape: f32[8,128], index: 3, kind: input, shape index: {}]   ;;  %s737_s4 = inlined_call_operand.hbm [shape: bf16[16,128], index: 4, kind: output, shape index: {}]  }
   0x1   :  { %10 = vsyncpa [#allocation6], 0 }
   0x2   :  { %11 = vsyncpa [#allocation9], 0 }
   0x3   :  { %12 = vsyncpa [#allocation4], 0  ;;  %s30_s17 = sshll.u32 %s734_s1, 4  ;;  %s674_s18 = smov [#allocation5]   ;;  %s31_s17 = int_to_ptr.hbm [resolvable:$true] %s30_s17 }
   0x4   :  { %s32_s19 = sshll.u32 %s674_s18, 4  ;;  %s17_s22 = sshll.u32 %s733_s0, 4  ;;  %s33_s19 = int_to_ptr.vmem [resolvable:$true] %s32_s19  ;;  %s18_s22 = int_to_ptr.hbm [resolvable:$true] %s17_s22 }
   0x5   :  { %s675_s23 = smov 64   ;;  %s676_s24 = smov 4  }
   0x6   :  { %38 = dma.hbm_to_vmem [thread:$0]  %s31_s17, 128, %s33_s19, [#allocation6], %s675_s23, %s675_s23, %s676_s24  }
   0x7   :  { %s677_s25 = smov [#allocation2]   ;;  %s43_s1 = sshll.u32 %s735_s2, 4  ;;  %s44_s1 = int_to_ptr.hbm [resolvable:$true] %s43_s1 }
   0x8   :  { %s19_s26 = sshll.u32 %s677_s25, 4  ;;  %s57_s30 = sshll.u32 %s736_s3, 4  ;;  %s20_s26 = int_to_ptr.vmem [resolvable:$true] %s19_s26  ;;  %s58_s30 = int_to_ptr.hbm [resolvable:$true] %s57_s30 }
   0x9   :  { %25 = dma.hbm_to_vmem [thread:$0]  %s18_s22, 128, %s20_s26, [#allocation3], %s675_s23, %s675_s23, %s676_s24  }
   0xa   :  { %s678_s5 = smov [#allocation7]   ;;  %s679_s7 = smov [#allocation8]  }
   0xb   :  { %s45_s6 = sshll.u32 %s678_s5, 4  ;;  %s59_s2 = sshll.u32 %s679_s7, 4  ;;  %s46_s6 = int_to_ptr.vmem [resolvable:$true] %s45_s6  ;;  %s60_s2 = int_to_ptr.vmem [resolvable:$true] %s59_s2 }
   0xc   :  { %51 = dma.hbm_to_vmem [thread:$0]  %s44_s1, 3072, %s46_s6, [#allocation6], %s675_s23, %s675_s23, %s676_s24  }
   0xd   :  { %62 = dma.hbm_to_vmem [thread:$0]  %s58_s30, 128, %s60_s2, [#allocation9]  }
   0xe   :  { %666 = dma.done.wait [#allocation3], 128  }
   0xf   :  { %667 = vsyncadd [#allocation3], 4294967168 }
  0x10   :  { %668 = dma.done.wait [#allocation6], 3200  }
  0x11   :  { %669 = vsyncadd [#allocation6], 4294964096 }
  0x12   :  { %670 = dma.done.wait [#allocation9], 128  }
  0x13   :  { %671 = vsyncadd [#allocation9], 4294967168  ;;  %v505_v0 = vld [vmem:[#allocation5] sm:$0xff]  ;;  %v504_v2 = vld [vmem:[#allocation2] sm:$0xff]  ;;  %vm97_vm0 = vcmask 130048   ;;  %s680_s3 = smov [#allocation10]  }
  0x14   :  { %v513_v1 = vld [vmem:[#allocation7 + $0x38] sm:$0xff]  ;;  %108 = vmatpush.bf16.msra.mxu0 %v505_v0  ;;  %v512_v3 = vld [vmem:[#allocation7 + $0x30] sm:$0xff]  ;;  %v511_v4 = vld [vmem:[#allocation7 + $0x28] sm:$0xff]  ;;  %s382_s8 = sshll.u32 %s680_s3, 4  ;;  %s384_s11 = sshll.u32 %s737_s4, 4  ;;  %s383_s8 = int_to_ptr.vmem [resolvable:$true] %s382_s8  ;;  %s385_s11 = int_to_ptr.hbm [resolvable:$true] %s384_s11 }
  0x15   :  { %184 = vmatpush.bf16.msra.mxu1 %v513_v1  ;;  %v510_v5 = vld [vmem:[#allocation7 + $0x20] sm:$0xff]  ;;  %v509_v6 = vld [vmem:[#allocation7 + $0x18] sm:$0xff]  ;;  %v508_v7 = vld [vmem:[#allocation7 + $0x10] sm:$0xff] }
  0x16   :  { %v507_v8 = vld [vmem:[#allocation7 + $0x8] sm:$0xff]  ;;  %v506_v9 = vld [vmem:[#allocation7] sm:$0xff]  ;;  %v521_v10 = vld [vmem:[#allocation7 + $0x78] sm:$0xff] }
  0x17   :  { %407 = vmatmul.msk.bf16.vlgmr.msra.gmra.mxu0 %vm97_vm0, %v504_v2  ;;  %268 = vmatpush.bf16.msra.mxu2 %v521_v10  ;;  %v520_v11 = vld [vmem:[#allocation7 + $0x70] sm:$0xff]  ;;  %v519_v12 = vld [vmem:[#allocation7 + $0x68] sm:$0xff]  ;;  %v518_v13 = vld [vmem:[#allocation7 + $0x60] sm:$0xff] }
  0x18   :  { %v542_v15 = vld [vmem:[#allocation8] ss:$0 sm:$0xff]  ;;  %v517_v22 = vld [vmem:[#allocation7 + $0x58] sm:$0xff]  ;;  %v516_v23 = vld [vmem:[#allocation7 + $0x50] sm:$0xff] }
  0x19   :  { %185 = vmatpush.bf16.msra.mxu1 %v512_v3  ;;  %v515_v24 = vld [vmem:[#allocation7 + $0x48] sm:$0xff]  ;;  %v514_v25 = vld [vmem:[#allocation7 + $0x40] sm:$0xff]  ;;  %v529_v26 = vld [vmem:[#allocation7 + $0xb8] sm:$0xff] }
  0x1a   :  { %360 = vmatpush.bf16.msra.mxu3 %v529_v26  ;;  %v528_v27 = vld [vmem:[#allocation7 + $0xb0] sm:$0xff]  ;;  %v543_v29 = vld [vmem:[#allocation8 + $0x1] ss:$0 sm:$0xff]  ;;  %v527_v36 = vld [vmem:[#allocation7 + $0xa8] sm:$0xff] }
  0x1b   :  { %269 = vmatpush.bf16.msra.mxu2 %v520_v11  ;;  %v526_v37 = vld [vmem:[#allocation7 + $0xa0] sm:$0xff]  ;;  %v525_v38 = vld [vmem:[#allocation7 + $0x98] sm:$0xff]  ;;  %v524_v39 = vld [vmem:[#allocation7 + $0x90] sm:$0xff] }
  0x1c   :  { %v523_v40 = vld [vmem:[#allocation7 + $0x88] sm:$0xff]  ;;  %v522_v41 = vld [vmem:[#allocation7 + $0x80] sm:$0xff] }
  0x1d   :  { %186 = vmatpush.bf16.msra.mxu1 %v511_v4  ;;  %v544_v42 = vld [vmem:[#allocation8 + $0x2] ss:$0 sm:$0xff]  ;;  %v545_v59 = vld [vmem:[#allocation8 + $0x3] ss:$0 sm:$0xff] }
  0x1e   :  { %361 = vmatpush.bf16.msra.mxu3 %v528_v27 }
  0x1f   :  { %270 = vmatpush.bf16.msra.mxu2 %v519_v12 }
  0x21   :  { %187 = vmatpush.bf16.msra.mxu1 %v510_v5 }
  0x22   :  { %362 = vmatpush.bf16.msra.mxu3 %v527_v36 }
  0x23   :  { %271 = vmatpush.bf16.msra.mxu2 %v518_v13 }
  0x25   :  { %188 = vmatpush.bf16.msra.mxu1 %v509_v6 }
  0x26   :  { %363 = vmatpush.bf16.msra.mxu3 %v526_v37 }
  0x27   :  { %272 = vmatpush.bf16.msra.mxu2 %v517_v22 }
  0x29   :  { %189 = vmatpush.bf16.msra.mxu1 %v508_v7 }
  0x2a   :  { %364 = vmatpush.bf16.msra.mxu3 %v525_v38 }
  0x2b   :  { %273 = vmatpush.bf16.msra.mxu2 %v516_v23 }
  0x2d   :  { %190 = vmatpush.bf16.msra.mxu1 %v507_v8 }
  0x2e   :  { %365 = vmatpush.bf16.msra.mxu3 %v524_v39 }
  0x2f   :  { %274 = vmatpush.bf16.msra.mxu2 %v515_v24 }
  0x31   :  { %191 = vmatpush.bf16.msra.mxu1 %v506_v9 }
  0x32   :  { %366 = vmatpush.bf16.msra.mxu3 %v523_v40 }
  0x33   :  { %275 = vmatpush.bf16.msra.mxu2 %v514_v25 }
  0x36   :  { %367 = vmatpush.bf16.msra.mxu3 %v522_v41 }
  0x94   :  { %v110_v14 = vpop.f32.mrf.mxu0 }
  0x95   :  { %v111_v16 = vadd.f32 %v542_v15, %v110_v14 }
  0x97   :  { %v115_v19 = vmax.f32 %v111_v16, 0.0 }
  0x9c   :  { %v112_v17 = vpop.f32.mrf.mxu0 }
  0x9d   :  { %v113_v18 = vadd.f32 %v542_v15, %v112_v17 }
  0x9f   :  { %v116_v20 = vmax.f32 %v113_v18, 0.0 }
  0xa1   :  { %v117_v21 = vpack.c.bf16 %v116_v20, %v115_v19 }
  0xa3   :  { %192 = vmatmul.bf16.vlgmr.msra.gmra.mxu1 %v117_v21 }
 0x120   :  { %v193_v28 = vpop.f32.mrf.mxu1 }
 0x121   :  { %v194_v30 = vadd.f32 %v543_v29, %v193_v28 }
 0x123   :  { %v198_v33 = vmax.f32 %v194_v30, 0.0 }
 0x128   :  { %v195_v31 = vpop.f32.mrf.mxu1 }
 0x129   :  { %v196_v32 = vadd.f32 %v543_v29, %v195_v31 }
 0x12b   :  { %v199_v34 = vmax.f32 %v196_v32, 0.0 }
 0x12d   :  { %v200_v35 = vpack.c.bf16 %v199_v34, %v198_v33 }
 0x12f   :  { %276 = vmatmul.bf16.vlgmr.msra.gmra.mxu2 %v200_v35 }
 0x1b2   :  { %v277_v43 = vpop.f32.mrf.mxu2 }
 0x1b3   :  { %v278_v44 = vadd.f32 %v544_v42, %v277_v43 }
 0x1b5   :  { %v282_v45 = vadd.f32 3.0, %v278_v44 }
 0x1b7   :  { %v284_v46 = vmax.f32 %v282_v45, 0.0 }
 0x1b9   :  { %v286_v49 = vmin.f32 %v284_v46, 6.0 }
 0x1ba   :  { %v279_v47 = vpop.f32.mrf.mxu2 }
 0x1bb   :  { %v280_v48 = vadd.f32 %v544_v42, %v279_v47  ;;  %v288_v52 = vmul.f32 %v286_v49, %v278_v44 }
 0x1bd   :  { %v283_v50 = vadd.f32 3.0, %v280_v48  ;;  %v290_v55 = vmul.f32 0.16666667, %v288_v52 }
 0x1bf   :  { %v285_v51 = vmax.f32 %v283_v50, 0.0 }
 0x1c1   :  { %v287_v53 = vmin.f32 %v285_v51, 6.0 }
 0x1c3   :  { %v289_v54 = vmul.f32 %v287_v53, %v280_v48 }
 0x1c5   :  { %v291_v56 = vmul.f32 0.16666667, %v289_v54 }
 0x1c7   :  { %v292_v57 = vpack.c.bf16 %v291_v56, %v290_v55 }
 0x1c9   :  { %368 = vmatmul.bf16.vlgmr.msra.gmra.mxu3 %v292_v57 }
 0x24c   :  { %v369_v58 = vpop.f32.mrf.mxu3 }
 0x24d   :  { %v370_v61 = vadd.f32 %v545_v59, %v369_v58 }
 0x254   :  { %v371_v60 = vpop.f32.mrf.mxu3 }
 0x255   :  { %v372_v62 = vadd.f32 %v545_v59, %v371_v60 }
 0x257   :  { %v533_v63 = vpack.c.bf16 %v372_v62, %v370_v61 }
 0x259   :  { %534 = vst [vmem:[#allocation10] sm:$0xff] %v533_v63  }
 0x25a   :  { %390 = dma.vmem_to_hbm [thread:$0]  %s383_s8, 128, %s385_s11, [#allocation4], %s675_s23, %s675_s23, %s676_s24  }
 0x25b   :  { %672 = dma.done.wait [#allocation4], 128  }
 0x25c   :  { %673 = vsyncadd [#allocation4], 4294967168 }
 0x25d   :  { %395 = vsyncpa [#allocation3], 1 }
 0x25e   :  { %396 = vsyncpa [#allocation6], 1 }
 0x25f   :  { %397 = vsyncpa [#allocation9], 1 }
 0x260   :  { %398 = vsyncpa [#allocation4], 1 }

</bundles_post_ra>
